<compile_context>
chip_gen: v7x
topology: tpu7x:2x2x1
jax: 0.10.0
libtpu: 0.0.40
codegen_flags: <defaults>
</compile_context>

<pallas_src>
import functools

import jax
import jax.numpy as jnp
from jax.experimental import pallas as pl
from jax.experimental.pallas import tpu as pltpu

_SUBLANE = 8
_MAX_LANE = 1024                 # wide lane dim -> long contiguous DMA + unmasked vst
_TARGET_BLOCK_BYTES = 1 << 20    # ~1 MiB per block


def _clipped_relu_kernel(x_ref, o_ref, *, min_val, max_val, invert):
    x = x_ref[...]
    if invert:
        # -sign(x)*abs(x) == -x for all floats (including +/-0).
        x = -x
    if min_val != float("-inf"):
        x = jnp.maximum(x, jnp.asarray(min_val, x.dtype))
    if max_val != float("inf"):
        x = jnp.minimum(x, jnp.asarray(max_val, x.dtype))
    o_ref[...] = x


def clipped_relu(x, min_val=0.0, max_val=float("inf"), invert_activation=False):
    """Pallas implementation of ClippedReLU.forward for arbitrary-shaped float x."""
    orig_shape = x.shape
    orig_dtype = x.dtype
    flat = x.reshape(-1)
    n = flat.shape[0]
    itemsize = jnp.dtype(orig_dtype).itemsize

    # --- choose a wide lane dim, shrinking for tiny inputs to avoid padding blowup.
    lane = _MAX_LANE
    while lane > 128 and n < lane * _SUBLANE:
        lane //= 2

    rows = pl.cdiv(n, lane)
    padded_n = rows * lane
    if padded_n != n:
        flat = jnp.pad(flat, (0, padded_n - n))
    x2d = flat.reshape(rows, lane)

    # --- block rows: ~1 MiB per block, multiple of 8 sublanes (or the full row
    # extent when the array is smaller than one block).
    target_rows = max(_SUBLANE,
                      (_TARGET_BLOCK_BYTES // (lane * itemsize)) // _SUBLANE * _SUBLANE)
    if rows <= target_rows:
        block_rows = rows          # single block == full array extent (always legal)
    else:
        block_rows = target_rows   # multiple of 8; ragged last block handled by Pallas
    grid = (pl.cdiv(rows, block_rows),)

    kernel = functools.partial(
        _clipped_relu_kernel,
        min_val=float(min_val),
        max_val=float(max_val),
        invert=bool(invert_activation),
    )

    out2d = pl.pallas_call(
        kernel,
        out_shape=jax.ShapeDtypeStruct(x2d.shape, orig_dtype),
        grid_spec=pltpu.PrefetchScalarGridSpec(
            num_scalar_prefetch=0,
            grid=grid,
            in_specs=[pl.BlockSpec((block_rows, lane), lambda i: (i, 0))],
            out_specs=pl.BlockSpec((block_rows, lane), lambda i: (i, 0)),
        ),
        compiler_params=pltpu.CompilerParams(
            dimension_semantics=("parallel",),
        ),
        cost_estimate=pl.CostEstimate(
            flops=2 * padded_n,
            transcendentals=0,
            bytes_accessed=2 * padded_n * itemsize,
        ),
    )(x2d)

    if padded_n != n:
        return out2d.reshape(-1)[:n].reshape(orig_shape)
    return out2d.reshape(orig_shape)


if __name__ == "__main__":
    key = jax.random.PRNGKey(0)

    # NCHW input, like the PyTorch module would see from a conv stack.
    x = jax.random.normal(key, (2, 4, 16, 16), dtype=jnp.float32)

    # Default ClippedReLU config: min_val=0, max_val=inf, invertActivation=False.
    out = jax.block_until_ready(
        clipped_relu(x, min_val=0.0, max_val=float("inf"), invert_activation=False)
    )
    ref = jnp.clip(x, 0.0, None)
    assert out.shape == x.shape and out.dtype == x.dtype
    assert jnp.allclose(out, ref), "mismatch vs reference"

    # invertActivation + finite max branch.
    out2 = jax.block_until_ready(
        clipped_relu(x, min_val=0.0, max_val=1.0, invert_activation=True)
    )
    ref2 = jnp.clip(-jnp.sign(x) * jnp.abs(x), 0.0, 1.0)
    assert jnp.allclose(out2, ref2), "mismatch vs reference (invert branch)"

    # Non-tile-aligned shape (exercises padding + slice-back path).
    y = jax.random.normal(jax.random.PRNGKey(1), (3, 5, 17, 13), dtype=jnp.float32)
    outy = jax.block_until_ready(clipped_relu(y, min_val=-0.5, max_val=0.5))
    refy = jnp.clip(y, -0.5, 0.5)
    assert outy.shape == y.shape and jnp.allclose(outy, refy), "mismatch (padded path)"

    # Larger-than-one-block shape (exercises multi-step grid + ragged last block).
    z = jax.random.normal(jax.random.PRNGKey(2), (8, 8, 64, 65), dtype=jnp.float32)
    outz = jax.block_until_ready(clipped_relu(z, min_val=0.0, max_val=2.0))
    refz = jnp.clip(z, 0.0, 2.0)
    assert outz.shape == z.shape and jnp.allclose(outz, refz), "mismatch (multi-block path)"

    print("KERNEL_OK")
</pallas_src>

<mosaic_0001>
module attributes {stable_mosaic.version = 11 : i64} {
  func.func @_clipped_relu_kernel(%arg0: i32, %arg1: memref<8x256xf32, #tpu.memory_space<vmem>>, %arg2: memref<8x256xf32, #tpu.memory_space<vmem>>) attributes {dimension_semantics = [#tpu.dimension_semantics<parallel>], iteration_bounds = array<i64: 1>, scalar_prefetch = 0 : i64, scratch_operands = 0 : i64, tpu.core_type = #tpu.core_type<tc>, window_params = [{transform_indices = @transform_0, window_bounds = array<i64: 8, 256>}, {transform_indices = @transform_1, window_bounds = array<i64: 8, 256>}]} {
    %c0 = arith.constant 0 : index
    %c0_0 = arith.constant 0 : index
    %0 = vector.load %arg1[%c0, %c0_0] : memref<8x256xf32, #tpu.memory_space<vmem>>, vector<8x256xf32>
    %cst = arith.constant 0.000000e+00 : f32
    %1 = vector.broadcast %cst : f32 to vector<8x256xf32>
    %2 = arith.maximumf %0, %1 : vector<8x256xf32>
    %c0_1 = arith.constant 0 : index
    %c0_2 = arith.constant 0 : index
    %3 = vector.load %arg2[%c0_1, %c0_2] : memref<8x256xf32, #tpu.memory_space<vmem>>, vector<8x256xf32>
    tpu.vector_store %arg2[%c0_1, %c0_2], %2 {strides = array<i32>} : memref<8x256xf32, #tpu.memory_space<vmem>>, vector<8x256xf32>,
    return
  }
  func.func @transform_0(%arg0: i32) -> (i32, i32) {
    %c0_i32 = arith.constant 0 : i32
    %c0_i32_0 = arith.constant 0 : i32
    return %arg0, %c0_i32 : i32, i32
  }
  func.func @transform_1(%arg0: i32) -> (i32, i32) {
    %c0_i32 = arith.constant 0 : i32
    %c0_i32_0 = arith.constant 0 : i32
    return %arg0, %c0_i32 : i32, i32
  }
}

</mosaic_0001>

<bundles_post_ra>
// kernel: tpu_custom_call.1
= control target key start
LH: loop header
LB: loop body
LE: loop exit
PB: predicated region body
PF: predicated region fallthrough
CT: control target
= control target key end

     0   :  { %6 = vsyncpa [#allocation3], 0  ;;  %s128_s0 = inlined_call_operand.hbm [shape: f32[8,256], index: 0, kind: input, shape index: {}]   ;;  %s129_s1 = inlined_call_operand.hbm [shape: f32[8,256], index: 1, kind: output, shape index: {}]  }
   0x1   :  { %7 = vsyncpa [#allocation4], 0  ;;  %s92_s6 = smov [#allocation2]   ;;  %s44_s10 = scalar_lea.hbm %s128_s0, 256 }
   0x2   :  { %s14_s7 = sshll.u32 %s92_s6, 4  ;;  %p45_p0 = scmp.ne.s32.totalorder %s128_s0, %s44_s10  ;;  %s15_s7 = int_to_ptr.vmem [resolvable:$true] %s14_s7 }
   0x3   :  { %p48_p1 = scmp.lt.u32.totalorder %s44_s10, %s128_s0 }
   0x5   :  { %p50_p2 = pnand %p48_p1, %p45_p0 }
   0x7   :  { %53 = shalt.err (!%p50_p2)
}
   0x8   :  { %s54_s15 = scalar_lea.vmem %s15_s7, 256  ;;  %p59_p4 = scmp.lt.s32.totalorder %s15_s7, %s15_s7 }
   0x9   :  { %p55_p3 = scmp.ne.s32.totalorder %s15_s7, %s54_s15  ;;  %p60_p5 = scmp.lt.s32.totalorder %s54_s15, %s54_s15 }
   0xb   :  { %p61_p6 = por %p60_p5, %p59_p4 }
   0xd   :  { %p62_p7 = pnand %p61_p6, %p55_p3 }
   0xf   :  { %65 = shalt.err (!%p62_p7)
}
  0x10   :  { %17 = dma.hbm_to_vmem [thread:$0]  %s128_s0, 256, %s15_s7, [#allocation3]  }
  0x11   :  { %88 = dma.done.wait [#allocation3], 256  }
  0x12   :  { %89 = vsyncadd [#allocation3], 4294967040  ;;  %s93_s18 = smov [#allocation5]   ;;  %v21_v0 = vld [vmem:[#allocation2] sm:$0xff]  ;;  %v22_v1 = vld [vmem:[#allocation2 + $0x8] sm:$0xff] }
  0x13   :  { %s33_s19 = sshll.u32 %s93_s18, 4  ;;  %v23_v2 = vmax.f32 %v21_v0, 0.0  ;;  %v24_v3 = vmax.f32 %v22_v1, 0.0  ;;  %s34_s19 = int_to_ptr.vmem [resolvable:$true] %s33_s19 }
  0x14   :  { %s66_s20 = scalar_lea.vmem %s34_s19, 256  ;;  %p71_p9 = scmp.lt.s32.totalorder %s34_s19, %s34_s19 }
  0x15   :  { %25 = vst [vmem:[#allocation5] sm:$0xff] %v23_v2  ;;  %26 = vst [vmem:[#allocation5 + $0x8] sm:$0xff] %v24_v3  ;;  %p67_p8 = scmp.ne.s32.totalorder %s34_s19, %s66_s20  ;;  %p72_p10 = scmp.lt.s32.totalorder %s66_s20, %s66_s20 }
  0x17   :  { %p73_p11 = por %p72_p10, %p71_p9 }
  0x19   :  { %p74_p12 = pnand %p73_p11, %p67_p8 }
  0x1b   :  { %77 = shalt.err (!%p74_p12)
}
  0x1c   :  { %s78_s22 = scalar_lea.hbm %s129_s1, 256 }
  0x1d   :  { %p79_p13 = scmp.ne.s32.totalorder %s129_s1, %s78_s22  ;;  %p82_p0 = scmp.lt.u32.totalorder %s78_s22, %s129_s1 }
  0x1f   :  { %p84_p1 = pnand %p82_p0, %p79_p13 }
  0x21   :  { %87 = shalt.err (!%p84_p1)
}
  0x22   :  { %36 = dma.vmem_to_hbm [thread:$0]  %s34_s19, 256, %s129_s1, [#allocation4]  }
  0x23   :  { %90 = dma.done.wait [#allocation4], 256  }
  0x24   :  { %91 = vsyncadd [#allocation4], 4294967040 }
  0x25   :  { %40 = vsyncpa [#allocation3], 1 }
  0x26   :  { %41 = vsyncpa [#allocation4], 1 }

</bundles_post_ra>
